<compile_context>
chip_gen: v7x
topology: tpu7x:2x2x1
jax: 0.10.0
libtpu: 0.0.40
codegen_flags: <defaults>
</compile_context>

<pallas_src>
from functools import partial

import jax
import jax.numpy as jnp
from jax import lax
from jax.experimental import pallas as pl
from jax.experimental.pallas import tpu as pltpu


def _round_up(x, m):
    return ((x + m - 1) // m) * m


def _cdiv(a, b):
    return -(-a // b)


def _vmem_cap_bytes():
    """Generation-aware VMEM cap with ~15% headroom (v5e/v6e: ~109 MiB,
    v7x: ~54 MiB).  Falls back to a conservative 64 MiB if the query fails."""
    try:
        cap = int(pltpu.get_tpu_info().vmem_capacity_bytes)
        return max(32 << 20, int(cap * 0.85))
    except Exception:
        return 64 << 20


def mlp_kernel(x_ref, w_in_ref, b_in_ref, w_hid_ref, b_hid_ref,
               w_out_ref, b_out_ref, o_ref, *, n_hidden_layers, compute_dtype):
    """One batch tile of the MLP.  All feature dims are padded to 128 lanes, so
    every jnp.dot is lane/sublane aligned and the output store is unmasked.
    Matmuls run in `compute_dtype` (bf16 by default) with f32 accumulation;
    bias add + ReLU epilogue stays f32."""
    cd = compute_dtype

    # Input layer (no activation in the reference module).
    h = (jnp.dot(x_ref[...].astype(cd), w_in_ref[...].astype(cd),
                 preferred_element_type=jnp.float32)
         + b_in_ref[...].astype(jnp.float32))

    n_relu = n_hidden_layers - 1
    if n_relu > 0:
        if n_hidden_layers <= 4:
            # Small L: static unroll, full LLO scheduler visibility.
            for i in range(n_relu):
                h = (jnp.dot(h.astype(cd), w_hid_ref[i].astype(cd),
                             preferred_element_type=jnp.float32)
                     + b_hid_ref[i].astype(jnp.float32))
                h = jnp.maximum(h, 0.0)
        else:
            # Large L: rolled loop with dynamic layer index keeps code size and
            # vreg live ranges bounded (one layer's weights live at a time).
            def body(i, h):
                h = (jnp.dot(h.astype(cd), w_hid_ref[i].astype(cd),
                             preferred_element_type=jnp.float32)
                     + b_hid_ref[i].astype(jnp.float32))
                return jnp.maximum(h, 0.0)
            h = lax.fori_loop(0, n_relu, body, h, unroll=2)

    # Final hidden Linear (no ReLU), matching the PyTorch module.
    h = (jnp.dot(h.astype(cd), w_hid_ref[n_hidden_layers - 1].astype(cd),
                 preferred_element_type=jnp.float32)
         + b_hid_ref[n_hidden_layers - 1].astype(jnp.float32))

    # Output layer; o_ref's last dim is a multiple of 128 -> unmasked vst.
    o_ref[...] = (jnp.dot(h.astype(cd), w_out_ref[...].astype(cd),
                          preferred_element_type=jnp.float32)
                  + b_out_ref[...].astype(jnp.float32)).astype(o_ref.dtype)


def prepare_params(params, *, use_bf16_matmul=True):
    """Zero-pad every feature dimension to a multiple of 128 (lane width) so
    MXU operands and the output store are lane-dense.  Zero padding keeps the
    math exact.  Weights default to bf16 (native MXU dtype on v5e/v6e/v7x);
    biases stay f32 (epilogue runs in f32)."""
    # TODO(synk): optional fp8 (e4m3) weight storage on v7x (bf16 act x fp8 w)
    # to halve the resident footprint under the 64 MiB cap; needs accuracy
    # validation so it is not enabled by default.
    w_in, b_in, w_hid, b_hid, w_out, b_out = params
    n_in, n_hid = w_in.shape
    n_out = w_out.shape[1]
    p_in, p_hid, p_out = (_round_up(d, 128) for d in (n_in, n_hid, n_out))

    wd = jnp.bfloat16 if use_bf16_matmul else w_in.dtype

    w_in_p = jnp.pad(w_in, ((0, p_in - n_in), (0, p_hid - n_hid))).astype(wd)
    b_in_p = jnp.pad(b_in, ((0, 0), (0, p_hid - n_hid)))
    w_hid_p = jnp.pad(w_hid, ((0, 0), (0, p_hid - n_hid),
                              (0, p_hid - n_hid))).astype(wd)
    b_hid_p = jnp.pad(b_hid, ((0, 0), (0, 0), (0, p_hid - n_hid)))
    w_out_p = jnp.pad(w_out, ((0, p_hid - n_hid), (0, p_out - n_out))).astype(wd)
    b_out_p = jnp.pad(b_out, ((0, 0), (0, p_out - n_out)))
    return (w_in_p, b_in_p, w_hid_p, b_hid_p, w_out_p, b_out_p), (n_in, n_out)


def net_forward(x, padded_params, n_hidden_layers, n_out, *,
                tile_b_target=256, use_bf16_matmul=True):
    w_in, b_in, w_hid, b_hid, w_out, b_out = padded_params
    B, n_in = x.shape
    p_in, p_hid = w_in.shape
    p_out = w_out.shape[1]
    L = w_hid.shape[0]

    # Batch tiling: split the batch as evenly as possible into ~tile_b_target
    # row tiles; when B allows, force >= 2 grid steps so the "parallel" axis
    # actually shards across v7x's 2 TensorCores.  Weights/biases use constant
    # index_maps (VMEM-resident across steps); only x / out pipeline.
    n_tiles = max(1, _cdiv(B, tile_b_target))
    if B >= 16:
        n_tiles = max(n_tiles, 2)
    tile_b = _round_up(_cdiv(B, n_tiles), 8)
    pB = tile_b * n_tiles
    x_p = jnp.pad(x, ((0, pB - B), (0, p_in - n_in)))

    compute_dtype = jnp.bfloat16 if use_bf16_matmul else jnp.float32
    kernel = partial(mlp_kernel, n_hidden_layers=n_hidden_layers,
                     compute_dtype=compute_dtype)

    # Advisory cost model for XLA scheduling around the custom call.
    flops = 2 * pB * (p_in * p_hid + L * p_hid * p_hid + p_hid * p_out)
    bytes_accessed = sum(int(a.size) * a.dtype.itemsize
                         for a in (x_p, w_in, b_in, w_hid, b_hid, w_out, b_out))
    bytes_accessed += pB * p_out * x.dtype.itemsize
    cost = pl.CostEstimate(flops=flops, transcendentals=0,
                           bytes_accessed=bytes_accessed)

    # Dtype-aware VMEM budget: resident weights (bf16 = half), double-buffered
    # x/out tiles, activation staging headroom; 10% slack, gen-aware cap.
    weight_bytes = sum(int(a.size) * a.dtype.itemsize
                       for a in (w_in, b_in, w_hid, b_hid, w_out, b_out))
    tile_bytes = 2 * tile_b * (p_in + p_out) * x.dtype.itemsize \
        + 4 * tile_b * p_hid * 4
    vmem_cap = _vmem_cap_bytes()
    # TODO(synk): if L*p_hid^2 weights ever exceed the VMEM cap (huge models on
    # v7x's 64 MiB), switch w_hid to memory_space=pl.ANY and stream one layer
    # at a time with a manual double-buffered make_async_copy, prefetching
    # layer i+1 during layer i's matmul.

    def build(single_buffer_weights):
        wfac = 1 if single_buffer_weights else 2
        vmem_limit = int(min(max(int(1.1 * (wfac * weight_bytes + tile_bytes)),
                                 32 << 20), vmem_cap))

        def const_spec(shp):
            kw = {}
            if single_buffer_weights:
                # Constant index_map -> no need to double-buffer the weights.
                kw["pipeline_mode"] = pl.Buffered(1)
            return pl.BlockSpec(shp, lambda i: (0,) * len(shp), **kw)

        return pl.pallas_call(
            kernel,
            out_shape=jax.ShapeDtypeStruct((pB, p_out), x.dtype),
            grid_spec=pl.GridSpec(
                grid=(pB // tile_b,),
                in_specs=[pl.BlockSpec((tile_b, p_in), lambda i: (i, 0)),
                          const_spec(w_in.shape), const_spec(b_in.shape),
                          const_spec(w_hid.shape), const_spec(b_hid.shape),
                          const_spec(w_out.shape), const_spec(b_out.shape)],
                out_specs=pl.BlockSpec((tile_b, p_out), lambda i: (i, 0)),
            ),
            compiler_params=pltpu.CompilerParams(
                dimension_semantics=("parallel",),
                vmem_limit_bytes=vmem_limit),
            cost_estimate=cost,
        )

    args = (x_p, w_in, b_in, w_hid, b_hid, w_out, b_out)
    try:
        out_p = build(True)(*args)
    except Exception:
        # Fallback for JAX builds that reject Buffered(1): default pipelining.
        out_p = build(False)(*args)

    # Slice off batch and output-feature padding outside the kernel.
    return out_p[:B, :n_out]


def init_params(key, n_input, n_hidden, n_hidden_layers, n_output):
    """Deterministic PyTorch-style uniform(-1/sqrt(fan_in), 1/sqrt(fan_in))."""
    ks = jax.random.split(key, 6)

    def uni(k, shape, fan_in):
        b = 1.0 / jnp.sqrt(jnp.float32(fan_in))
        return jax.random.uniform(k, shape, jnp.float32, -b, b)

    w_in = uni(ks[0], (n_input, n_hidden), n_input)
    b_in = uni(ks[1], (1, n_hidden), n_input)
    w_hid = uni(ks[2], (n_hidden_layers, n_hidden, n_hidden), n_hidden)
    b_hid = uni(ks[3], (n_hidden_layers, 1, n_hidden), n_hidden)
    w_out = uni(ks[4], (n_hidden, n_output), n_hidden)
    b_out = uni(ks[5], (1, n_output), n_hidden)
    return (w_in, b_in, w_hid, b_hid, w_out, b_out)


def net_forward_ref(x, params, n_hidden_layers):
    """Pure-JAX reference, mirrors the PyTorch forward exactly."""
    w_in, b_in, w_hid, b_hid, w_out, b_out = params
    h = x @ w_in + b_in
    for i in range(n_hidden_layers - 1):
        h = jnp.maximum(h @ w_hid[i] + b_hid[i], 0.0)
    h = h @ w_hid[n_hidden_layers - 1] + b_hid[n_hidden_layers - 1]
    return h @ w_out + b_out


if __name__ == "__main__":
    N_input, N_hidden, N_hidden_layers, N_output = 16, 32, 3, 4
    batch = 8

    key = jax.random.PRNGKey(0)
    k_x, k_p = jax.random.split(key)
    x = jax.random.normal(k_x, (batch, N_input), jnp.float32)
    params = init_params(k_p, N_input, N_hidden, N_hidden_layers, N_output)
    ref = net_forward_ref(x, params, N_hidden_layers)

    # 1) f32 MXU path: tight correctness check against the pure-JAX reference.
    pp_f32, (_, n_out) = prepare_params(params, use_bf16_matmul=False)
    out_f32 = net_forward(x, pp_f32, N_hidden_layers, n_out,
                          use_bf16_matmul=False)
    out_f32 = jax.block_until_ready(out_f32)
    assert out_f32.shape == (batch, N_output)
    assert jnp.allclose(out_f32, ref, atol=1e-5, rtol=1e-5)

    # 2) Default production path (bf16 MXU, f32 accumulation): looser tolerance.
    pp_bf16, _ = prepare_params(params)          # bf16 weights by default
    out_bf16 = net_forward(x, pp_bf16, N_hidden_layers, n_out)  # bf16 default
    out_bf16 = jax.block_until_ready(out_bf16)
    assert out_bf16.shape == (batch, N_output)
    assert jnp.allclose(out_bf16, ref, atol=5e-2, rtol=5e-2)

    print("KERNEL_OK")
</pallas_src>

<mosaic_0001>
module attributes {stable_mosaic.version = 11 : i64} {
  func.func @mlp_kernel(%arg0: i32, %arg1: memref<8x128xf32, #tpu.memory_space<vmem>>, %arg2: memref<128x128xf32, #tpu.memory_space<vmem>>, %arg3: memref<1x128xf32, #tpu.memory_space<vmem>>, %arg4: memref<3x128x128xf32, #tpu.memory_space<vmem>>, %arg5: memref<3x1x128xf32, #tpu.memory_space<vmem>>, %arg6: memref<128x128xf32, #tpu.memory_space<vmem>>, %arg7: memref<1x128xf32, #tpu.memory_space<vmem>>, %arg8: memref<8x128xf32, #tpu.memory_space<vmem>>) attributes {dimension_semantics = [#tpu.dimension_semantics<parallel>], iteration_bounds = array<i64: 1>, scalar_prefetch = 0 : i64, scratch_operands = 0 : i64, tpu.core_type = #tpu.core_type<tc>, window_params = [{transform_indices = @transform_0, window_bounds = array<i64: 8, 128>}, {pipeline_mode = #tpu.pipeline_mode<synchronous>, transform_indices = @transform_1, window_bounds = array<i64: 128, 128>}, {pipeline_mode = #tpu.pipeline_mode<synchronous>, transform_indices = @transform_2, window_bounds = array<i64: 1, 128>}, {pipeline_mode = #tpu.pipeline_mode<synchronous>, transform_indices = @transform_3, window_bounds = array<i64: 3, 128, 128>}, {pipeline_mode = #tpu.pipeline_mode<synchronous>, transform_indices = @transform_4, window_bounds = array<i64: 3, 1, 128>}, {pipeline_mode = #tpu.pipeline_mode<synchronous>, transform_indices = @transform_5, window_bounds = array<i64: 128, 128>}, {pipeline_mode = #tpu.pipeline_mode<synchronous>, transform_indices = @transform_6, window_bounds = array<i64: 1, 128>}, {transform_indices = @transform_7, window_bounds = array<i64: 8, 128>}]} {
    %c0 = arith.constant 0 : index
    %c0_0 = arith.constant 0 : index
    %0 = vector.load %arg1[%c0, %c0_0] : memref<8x128xf32, #tpu.memory_space<vmem>>, vector<8x128xf32>
    %c0_1 = arith.constant 0 : index
    %c0_2 = arith.constant 0 : index
    %1 = vector.load %arg2[%c0_1, %c0_2] : memref<128x128xf32, #tpu.memory_space<vmem>>, vector<128x128xf32>
    %cst = arith.constant dense<0.000000e+00> : vector<8x128xf32>
    %2 = tpu.matmul %0, %1, %cst {dimension_numbers = #tpu.dot_dimension_numbers<[1], [0], [0], [1], [0, 0, 1, 1], [], []>} : vector<8x128xf32>, vector<128x128xf32>, vector<8x128xf32> -> vector<8x128xf32>
    %c0_3 = arith.constant 0 : index
    %c0_4 = arith.constant 0 : index
    %3 = vector.load %arg3[%c0_3, %c0_4] : memref<1x128xf32, #tpu.memory_space<vmem>>, vector<1x128xf32>
    %4 = vector.broadcast %3 : vector<1x128xf32> to vector<8x128xf32>
    %5 = arith.addf %2, %4 : vector<8x128xf32>
    %c0_5 = arith.constant 0 : index
    %c0_6 = arith.constant 0 : index
    %c0_7 = arith.constant 0 : index
    %6 = vector.load %arg4[%c0_5, %c0_6, %c0_7] : memref<3x128x128xf32, #tpu.memory_space<vmem>>, vector<1x128x128xf32>
    %7 = vector.shape_cast %6 : vector<1x128x128xf32> to vector<128x128xf32>
    %cst_8 = arith.constant dense<0.000000e+00> : vector<8x128xf32>
    %8 = tpu.matmul %5, %7, %cst_8 {dimension_numbers = #tpu.dot_dimension_numbers<[1], [0], [0], [1], [0, 0, 1, 1], [], []>} : vector<8x128xf32>, vector<128x128xf32>, vector<8x128xf32> -> vector<8x128xf32>
    %c0_9 = arith.constant 0 : index
    %c0_10 = arith.constant 0 : index
    %c0_11 = arith.constant 0 : index
    %9 = vector.load %arg5[%c0_9, %c0_10, %c0_11] : memref<3x1x128xf32, #tpu.memory_space<vmem>>, vector<1x1x128xf32>
    %10 = vector.shape_cast %9 : vector<1x1x128xf32> to vector<1x128xf32>
    %11 = vector.broadcast %10 : vector<1x128xf32> to vector<8x128xf32>
    %12 = arith.addf %8, %11 : vector<8x128xf32>
    %cst_12 = arith.constant 0.000000e+00 : f32
    %13 = vector.broadcast %cst_12 : f32 to vector<8x128xf32>
    %14 = arith.maximumf %12, %13 : vector<8x128xf32>
    %c1 = arith.constant 1 : index
    %c0_13 = arith.constant 0 : index
    %c0_14 = arith.constant 0 : index
    %15 = vector.load %arg4[%c1, %c0_13, %c0_14] : memref<3x128x128xf32, #tpu.memory_space<vmem>>, vector<1x128x128xf32>
    %16 = vector.shape_cast %15 : vector<1x128x128xf32> to vector<128x128xf32>
    %cst_15 = arith.constant dense<0.000000e+00> : vector<8x128xf32>
    %17 = tpu.matmul %14, %16, %cst_15 {dimension_numbers = #tpu.dot_dimension_numbers<[1], [0], [0], [1], [0, 0, 1, 1], [], []>} : vector<8x128xf32>, vector<128x128xf32>, vector<8x128xf32> -> vector<8x128xf32>
    %c1_16 = arith.constant 1 : index
    %c0_17 = arith.constant 0 : index
    %c0_18 = arith.constant 0 : index
    %18 = vector.load %arg5[%c1_16, %c0_17, %c0_18] : memref<3x1x128xf32, #tpu.memory_space<vmem>>, vector<1x1x128xf32>
    %19 = vector.shape_cast %18 : vector<1x1x128xf32> to vector<1x128xf32>
    %20 = vector.broadcast %19 : vector<1x128xf32> to vector<8x128xf32>
    %21 = arith.addf %17, %20 : vector<8x128xf32>
    %cst_19 = arith.constant 0.000000e+00 : f32
    %22 = vector.broadcast %cst_19 : f32 to vector<8x128xf32>
    %23 = arith.maximumf %21, %22 : vector<8x128xf32>
    %c2 = arith.constant 2 : index
    %c0_20 = arith.constant 0 : index
    %c0_21 = arith.constant 0 : index
    %24 = vector.load %arg4[%c2, %c0_20, %c0_21] : memref<3x128x128xf32, #tpu.memory_space<vmem>>, vector<1x128x128xf32>
    %25 = vector.shape_cast %24 : vector<1x128x128xf32> to vector<128x128xf32>
    %cst_22 = arith.constant dense<0.000000e+00> : vector<8x128xf32>
    %26 = tpu.matmul %23, %25, %cst_22 {dimension_numbers = #tpu.dot_dimension_numbers<[1], [0], [0], [1], [0, 0, 1, 1], [], []>} : vector<8x128xf32>, vector<128x128xf32>, vector<8x128xf32> -> vector<8x128xf32>
    %c2_23 = arith.constant 2 : index
    %c0_24 = arith.constant 0 : index
    %c0_25 = arith.constant 0 : index
    %27 = vector.load %arg5[%c2_23, %c0_24, %c0_25] : memref<3x1x128xf32, #tpu.memory_space<vmem>>, vector<1x1x128xf32>
    %28 = vector.shape_cast %27 : vector<1x1x128xf32> to vector<1x128xf32>
    %29 = vector.broadcast %28 : vector<1x128xf32> to vector<8x128xf32>
    %30 = arith.addf %26, %29 : vector<8x128xf32>
    %c0_26 = arith.constant 0 : index
    %c0_27 = arith.constant 0 : index
    %31 = vector.load %arg6[%c0_26, %c0_27] : memref<128x128xf32, #tpu.memory_space<vmem>>, vector<128x128xf32>
    %cst_28 = arith.constant dense<0.000000e+00> : vector<8x128xf32>
    %32 = tpu.matmul %30, %31, %cst_28 {dimension_numbers = #tpu.dot_dimension_numbers<[1], [0], [0], [1], [0, 0, 1, 1], [], []>} : vector<8x128xf32>, vector<128x128xf32>, vector<8x128xf32> -> vector<8x128xf32>
    %c0_29 = arith.constant 0 : index
    %c0_30 = arith.constant 0 : index
    %33 = vector.load %arg7[%c0_29, %c0_30] : memref<1x128xf32, #tpu.memory_space<vmem>>, vector<1x128xf32>
    %34 = vector.broadcast %33 : vector<1x128xf32> to vector<8x128xf32>
    %35 = arith.addf %32, %34 : vector<8x128xf32>
    %c0_31 = arith.constant 0 : index
    %c0_32 = arith.constant 0 : index
    %36 = vector.load %arg8[%c0_31, %c0_32] : memref<8x128xf32, #tpu.memory_space<vmem>>, vector<8x128xf32>
    tpu.vector_store %arg8[%c0_31, %c0_32], %35 {strides = array<i32>} : memref<8x128xf32, #tpu.memory_space<vmem>>, vector<8x128xf32>,
    return
  }
  func.func @transform_0(%arg0: i32) -> (i32, i32) {
    %c0_i32 = arith.constant 0 : i32
    %c0_i32_0 = arith.constant 0 : i32
    return %arg0, %c0_i32 : i32, i32
  }
  func.func @transform_1(%arg0: i32) -> (i32, i32) {
    %c0_i32 = arith.constant 0 : i32
    %c0_i32_0 = arith.constant 0 : i32
    %c0_i32_1 = arith.constant 0 : i32
    return %c0_i32, %c0_i32_0 : i32, i32
  }
  func.func @transform_2(%arg0: i32) -> (i32, i32) {
    %c0_i32 = arith.constant 0 : i32
    %c0_i32_0 = arith.constant 0 : i32
    %c0_i32_1 = arith.constant 0 : i32
    return %c0_i32, %c0_i32_0 : i32, i32
  }
  func.func @transform_3(%arg0: i32) -> (i32, i32, i32) {
    %c0_i32 = arith.constant 0 : i32
    %c0_i32_0 = arith.constant 0 : i32
    %c0_i32_1 = arith.constant 0 : i32
    %c0_i32_2 = arith.constant 0 : i32
    return %c0_i32, %c0_i32_0, %c0_i32_1 : i32, i32, i32
  }
  func.func @transform_4(%arg0: i32) -> (i32, i32, i32) {
    %c0_i32 = arith.constant 0 : i32
    %c0_i32_0 = arith.constant 0 : i32
    %c0_i32_1 = arith.constant 0 : i32
    %c0_i32_2 = arith.constant 0 : i32
    return %c0_i32, %c0_i32_0, %c0_i32_1 : i32, i32, i32
  }
  func.func @transform_5(%arg0: i32) -> (i32, i32) {
    %c0_i32 = arith.constant 0 : i32
    %c0_i32_0 = arith.constant 0 : i32
    %c0_i32_1 = arith.constant 0 : i32
    return %c0_i32, %c0_i32_0 : i32, i32
  }
  func.func @transform_6(%arg0: i32) -> (i32, i32) {
    %c0_i32 = arith.constant 0 : i32
    %c0_i32_0 = arith.constant 0 : i32
    %c0_i32_1 = arith.constant 0 : i32
    return %c0_i32, %c0_i32_0 : i32, i32
  }
  func.func @transform_7(%arg0: i32) -> (i32, i32) {
    %c0_i32 = arith.constant 0 : i32
    %c0_i32_0 = arith.constant 0 : i32
    return %arg0, %c0_i32 : i32, i32
  }
}

module attributes {stable_mosaic.version = 11 : i64} {
  func.func @mlp_kernel(%arg0: i32, %arg1: memref<8x128xf32, #tpu.memory_space<vmem>>, %arg2: memref<128x128xf32, #tpu.memory_space<vmem>>, %arg3: memref<1x128xf32, #tpu.memory_space<vmem>>, %arg4: memref<3x128x128xf32, #tpu.memory_space<vmem>>, %arg5: memref<3x1x128xf32, #tpu.memory_space<vmem>>, %arg6: memref<128x128xf32, #tpu.memory_space<vmem>>, %arg7: memref<1x128xf32, #tpu.memory_space<vmem>>, %arg8: memref<8x128xf32, #tpu.memory_space<vmem>>) attributes {dimension_semantics = [#tpu.dimension_semantics<parallel>], iteration_bounds = array<i64: 1>, scalar_prefetch = 0 : i64, scratch_operands = 0 : i64, tpu.core_type = #tpu.core_type<tc>, window_params = [{transform_indices = @transform_0, window_bounds = array<i64: 8, 128>}, {pipeline_mode = #tpu.pipeline_mode<synchronous>, transform_indices = @transform_1, window_bounds = array<i64: 128, 128>}, {pipeline_mode = #tpu.pipeline_mode<synchronous>, transform_indices = @transform_2, window_bounds = array<i64: 1, 128>}, {pipeline_mode = #tpu.pipeline_mode<synchronous>, transform_indices = @transform_3, window_bounds = array<i64: 3, 128, 128>}, {pipeline_mode = #tpu.pipeline_mode<synchronous>, transform_indices = @transform_4, window_bounds = array<i64: 3, 1, 128>}, {pipeline_mode = #tpu.pipeline_mode<synchronous>, transform_indices = @transform_5, window_bounds = array<i64: 128, 128>}, {pipeline_mode = #tpu.pipeline_mode<synchronous>, transform_indices = @transform_6, window_bounds = array<i64: 1, 128>}, {transform_indices = @transform_7, window_bounds = array<i64: 8, 128>}]} {
    %c0 = arith.constant 0 : index
    %c0_0 = arith.constant 0 : index
    %0 = vector.load %arg1[%c0, %c0_0] : memref<8x128xf32, #tpu.memory_space<vmem>>, vector<8x128xf32>
    %c0_1 = arith.constant 0 : index
    %c0_2 = arith.constant 0 : index
    %1 = vector.load %arg2[%c0_1, %c0_2] : memref<128x128xf32, #tpu.memory_space<vmem>>, vector<128x128xf32>
    %cst = arith.constant dense<0.000000e+00> : vector<8x128xf32>
    %2 = tpu.matmul %0, %1, %cst {dimension_numbers = #tpu.dot_dimension_numbers<[1], [0], [0], [1], [0, 0, 1, 1], [], []>} : vector<8x128xf32>, vector<128x128xf32>, vector<8x128xf32> -> vector<8x128xf32>
    %c0_3 = arith.constant 0 : index
    %c0_4 = arith.constant 0 : index
    %3 = vector.load %arg3[%c0_3, %c0_4] : memref<1x128xf32, #tpu.memory_space<vmem>>, vector<1x128xf32>
    %4 = vector.broadcast %3 : vector<1x128xf32> to vector<8x128xf32>
    %5 = arith.addf %2, %4 : vector<8x128xf32>
    %c0_5 = arith.constant 0 : index
    %c0_6 = arith.constant 0 : index
    %c0_7 = arith.constant 0 : index
    %6 = vector.load %arg4[%c0_5, %c0_6, %c0_7] : memref<3x128x128xf32, #tpu.memory_space<vmem>>, vector<1x128x128xf32>
    %7 = vector.shape_cast %6 : vector<1x128x128xf32> to vector<128x128xf32>
    %cst_8 = arith.constant dense<0.000000e+00> : vector<8x128xf32>
    %8 = tpu.matmul %5, %7, %cst_8 {dimension_numbers = #tpu.dot_dimension_numbers<[1], [0], [0], [1], [0, 0, 1, 1], [], []>} : vector<8x128xf32>, vector<128x128xf32>, vector<8x128xf32> -> vector<8x128xf32>
    %c0_9 = arith.constant 0 : index
    %c0_10 = arith.constant 0 : index
    %c0_11 = arith.constant 0 : index
    %9 = vector.load %arg5[%c0_9, %c0_10, %c0_11] : memref<3x1x128xf32, #tpu.memory_space<vmem>>, vector<1x1x128xf32>
    %10 = vector.shape_cast %9 : vector<1x1x128xf32> to vector<1x128xf32>
    %11 = vector.broadcast %10 : vector<1x128xf32> to vector<8x128xf32>
    %12 = arith.addf %8, %11 : vector<8x128xf32>
    %cst_12 = arith.constant 0.000000e+00 : f32
    %13 = vector.broadcast %cst_12 : f32 to vector<8x128xf32>
    %14 = arith.maximumf %12, %13 : vector<8x128xf32>
    %c1 = arith.constant 1 : index
    %c0_13 = arith.constant 0 : index
    %c0_14 = arith.constant 0 : index
    %15 = vector.load %arg4[%c1, %c0_13, %c0_14] : memref<3x128x128xf32, #tpu.memory_space<vmem>>, vector<1x128x128xf32>
    %16 = vector.shape_cast %15 : vector<1x128x128xf32> to vector<128x128xf32>
    %cst_15 = arith.constant dense<0.000000e+00> : vector<8x128xf32>
    %17 = tpu.matmul %14, %16, %cst_15 {dimension_numbers = #tpu.dot_dimension_numbers<[1], [0], [0], [1], [0, 0, 1, 1], [], []>} : vector<8x128xf32>, vector<128x128xf32>, vector<8x128xf32> -> vector<8x128xf32>
    %c1_16 = arith.constant 1 : index
    %c0_17 = arith.constant 0 : index
    %c0_18 = arith.constant 0 : index
    %18 = vector.load %arg5[%c1_16, %c0_17, %c0_18] : memref<3x1x128xf32, #tpu.memory_space<vmem>>, vector<1x1x128xf32>
    %19 = vector.shape_cast %18 : vector<1x1x128xf32> to vector<1x128xf32>
    %20 = vector.broadcast %19 : vector<1x128xf32> to vector<8x128xf32>
    %21 = arith.addf %17, %20 : vector<8x128xf32>
    %cst_19 = arith.constant 0.000000e+00 : f32
    %22 = vector.broadcast %cst_19 : f32 to vector<8x128xf32>
    %23 = arith.maximumf %21, %22 : vector<8x128xf32>
    %c2 = arith.constant 2 : index
    %c0_20 = arith.constant 0 : index
    %c0_21 = arith.constant 0 : index
    %24 = vector.load %arg4[%c2, %c0_20, %c0_21] : memref<3x128x128xf32, #tpu.memory_space<vmem>>, vector<1x128x128xf32>
    %25 = vector.shape_cast %24 : vector<1x128x128xf32> to vector<128x128xf32>
    %cst_22 = arith.constant dense<0.000000e+00> : vector<8x128xf32>
    %26 = tpu.matmul %23, %25, %cst_22 {dimension_numbers = #tpu.dot_dimension_numbers<[1], [0], [0], [1], [0, 0, 1, 1], [], []>} : vector<8x128xf32>, vector<128x128xf32>, vector<8x128xf32> -> vector<8x128xf32>
    %c2_23 = arith.constant 2 : index
    %c0_24 = arith.constant 0 : index
    %c0_25 = arith.constant 0 : index
    %27 = vector.load %arg5[%c2_23, %c0_24, %c0_25] : memref<3x1x128xf32, #tpu.memory_space<vmem>>, vector<1x1x128xf32>
    %28 = vector.shape_cast %27 : vector<1x1x128xf32> to vector<1x128xf32>
    %29 = vector.broadcast %28 : vector<1x128xf32> to vector<8x128xf32>
    %30 = arith.addf %26, %29 : vector<8x128xf32>
    %c0_26 = arith.constant 0 : index
    %c0_27 = arith.constant 0 : index
    %31 = vector.load %arg6[%c0_26, %c0_27] : memref<128x128xf32, #tpu.memory_space<vmem>>, vector<128x128xf32>
    %cst_28 = arith.constant dense<0.000000e+00> : vector<8x128xf32>
    %32 = tpu.matmul %30, %31, %cst_28 {dimension_numbers = #tpu.dot_dimension_numbers<[1], [0], [0], [1], [0, 0, 1, 1], [], []>} : vector<8x128xf32>, vector<128x128xf32>, vector<8x128xf32> -> vector<8x128xf32>
    %c0_29 = arith.constant 0 : index
    %c0_30 = arith.constant 0 : index
    %33 = vector.load %arg7[%c0_29, %c0_30] : memref<1x128xf32, #tpu.memory_space<vmem>>, vector<1x128xf32>
    %34 = vector.broadcast %33 : vector<1x128xf32> to vector<8x128xf32>
    %35 = arith.addf %32, %34 : vector<8x128xf32>
    %c0_31 = arith.constant 0 : index
    %c0_32 = arith.constant 0 : index
    %36 = vector.load %arg8[%c0_31, %c0_32] : memref<8x128xf32, #tpu.memory_space<vmem>>, vector<8x128xf32>
    tpu.vector_store %arg8[%c0_31, %c0_32], %35 {strides = array<i32>} : memref<8x128xf32, #tpu.memory_space<vmem>>, vector<8x128xf32>,
    return
  }
  func.func @transform_0(%arg0: i32) -> (i32, i32) {
    %c0_i32 = arith.constant 0 : i32
    %c0_i32_0 = arith.constant 0 : i32
    return %arg0, %c0_i32 : i32, i32
  }
  func.func @transform_1(%arg0: i32) -> (i32, i32) {
    %c0_i32 = arith.constant 0 : i32
    %c0_i32_0 = arith.constant 0 : i32
    %c0_i32_1 = arith.constant 0 : i32
    return %c0_i32, %c0_i32_0 : i32, i32
  }
  func.func @transform_2(%arg0: i32) -> (i32, i32) {
    %c0_i32 = arith.constant 0 : i32
    %c0_i32_0 = arith.constant 0 : i32
    %c0_i32_1 = arith.constant 0 : i32
    return %c0_i32, %c0_i32_0 : i32, i32
  }
  func.func @transform_3(%arg0: i32) -> (i32, i32, i32) {
    %c0_i32 = arith.constant 0 : i32
    %c0_i32_0 = arith.constant 0 : i32
    %c0_i32_1 = arith.constant 0 : i32
    %c0_i32_2 = arith.constant 0 : i32
    return %c0_i32, %c0_i32_0, %c0_i32_1 : i32, i32, i32
  }
  func.func @transform_4(%arg0: i32) -> (i32, i32, i32) {
    %c0_i32 = arith.constant 0 : i32
    %c0_i32_0 = arith.constant 0 : i32
    %c0_i32_1 = arith.constant 0 : i32
    %c0_i32_2 = arith.constant 0 : i32
    return %c0_i32, %c0_i32_0, %c0_i32_1 : i32, i32, i32
  }
  func.func @transform_5(%arg0: i32) -> (i32, i32) {
    %c0_i32 = arith.constant 0 : i32
    %c0_i32_0 = arith.constant 0 : i32
    %c0_i32_1 = arith.constant 0 : i32
    return %c0_i32, %c0_i32_0 : i32, i32
  }
  func.func @transform_6(%arg0: i32) -> (i32, i32) {
    %c0_i32 = arith.constant 0 : i32
    %c0_i32_0 = arith.constant 0 : i32
    %c0_i32_1 = arith.constant 0 : i32
    return %c0_i32, %c0_i32_0 : i32, i32
  }
  func.func @transform_7(%arg0: i32) -> (i32, i32) {
    %c0_i32 = arith.constant 0 : i32
    %c0_i32_0 = arith.constant 0 : i32
    return %arg0, %c0_i32 : i32, i32
  }
}

</mosaic_0001>

<bundles_post_ra>
// kernel: tpu_custom_call.1
= control target key start
LH: loop header
LB: loop body
LE: loop exit
PB: predicated region body
PF: predicated region fallthrough
CT: control target
= control target key end

     0   :  { %12 = vsyncpa [#allocation3], 0  ;;  %s1269_s0 = inlined_call_operand.hbm [shape: f32[8,128], index: 0, kind: input, shape index: {}]   ;;  %s1270_s1 = inlined_call_operand.hbm [shape: f32[128,128], index: 1, kind: input, shape index: {}]   ;;  %s1271_s2 = inlined_call_operand.vmem [shape: f32[1,128], index: 2, kind: input, shape index: {}]   ;;  %s1272_s3 = inlined_call_operand.hbm [shape: f32[3,128,128], index: 3, kind: input, shape index: {}]   ;;  %s1273_s4 = inlined_call_operand.vmem [shape: f32[3,1,128], index: 4, kind: input, shape index: {}]   ;;  %s1274_s5 = inlined_call_operand.hbm [shape: f32[128,128], index: 5, kind: input, shape index: {}]   ;;  %s1275_s6 = inlined_call_operand.vmem [shape: f32[1,128], index: 6, kind: input, shape index: {}]   ;;  %s1276_s7 = inlined_call_operand.hbm [shape: f32[8,128], index: 7, kind: output, shape index: {}]  }
   0x1   :  { %13 = vsyncpa [#allocation6], 0 }
   0x2   :  { %14 = vsyncpa [#allocation9], 0 }
   0x3   :  { %15 = vsyncpa [#allocation4], 0  ;;  %s1085_s24 = smov [#allocation5]   ;;  %s967_s28 = scalar_lea.hbm %s1270_s1, 2048 }
   0x4   :  { %s31_s25 = sshll.u32 %s1085_s24, 4  ;;  %p968_p0 = scmp.ne.s32.totalorder %s1270_s1, %s967_s28  ;;  %s32_s25 = int_to_ptr.vmem [resolvable:$true] %s31_s25 }
   0x5   :  { %p971_p1 = scmp.lt.u32.totalorder %s967_s28, %s1270_s1 }
   0x7   :  { %p973_p2 = pnand %p971_p1, %p968_p0 }
   0x9   :  { %976 = shalt.err (!%p973_p2)
}
   0xa   :  { %s977_s10 = scalar_lea.vmem %s32_s25, 2048  ;;  %p982_p4 = scmp.lt.s32.totalorder %s32_s25, %s32_s25 }
   0xb   :  { %p978_p3 = scmp.ne.s32.totalorder %s32_s25, %s977_s10  ;;  %p983_p5 = scmp.lt.s32.totalorder %s977_s10, %s977_s10 }
   0xd   :  { %p984_p6 = por %p983_p5, %p982_p4 }
   0xf   :  { %p985_p7 = pnand %p984_p6, %p978_p3 }
  0x11   :  { %988 = shalt.err (!%p985_p7)
}
  0x12   :  { %s1086_s11 = smov 128   ;;  %s1087_s12 = smov 8  }
  0x13   :  { %37 = dma.hbm_to_vmem [thread:$0]  %s1270_s1, 2048, %s32_s25, [#allocation6], %s1086_s11, %s1086_s11, %s1087_s12  }
  0x14   :  { %s1088_s15 = smov [#allocation2]   ;;  %s1089_s17 = smov [#allocation7]  }
  0x15   :  { %s22_s16 = sshll.u32 %s1088_s15, 4  ;;  %s45_s18 = sshll.u32 %s1089_s17, 4  ;;  %s23_s16 = int_to_ptr.vmem [resolvable:$true] %s22_s16  ;;  %s46_s18 = int_to_ptr.vmem [resolvable:$true] %s45_s18 }
  0x16   :  { %s989_s21 = scalar_lea.hbm %s1269_s0, 128 }
  0x17   :  { %p990_p8 = scmp.ne.s32.totalorder %s1269_s0, %s989_s21  ;;  %p993_p9 = scmp.lt.u32.totalorder %s989_s21, %s1269_s0 }
  0x19   :  { %p995_p10 = pnand %p993_p9, %p990_p8 }
  0x1b   :  { %998 = shalt.err (!%p995_p10)
}
  0x1c   :  { %s999_s1 = scalar_lea.vmem %s23_s16, 128  ;;  %p1004_p12 = scmp.lt.s32.totalorder %s23_s16, %s23_s16 }
  0x1d   :  { %p1000_p11 = scmp.ne.s32.totalorder %s23_s16, %s999_s1  ;;  %p1005_p13 = scmp.lt.s32.totalorder %s999_s1, %s999_s1 }
  0x1f   :  { %p1006_p0 = por %p1005_p13, %p1004_p12 }
  0x21   :  { %p1007_p1 = pnand %p1006_p0, %p1000_p11 }
  0x23   :  { %1010 = shalt.err (!%p1007_p1)
}
  0x24   :  { %25 = dma.hbm_to_vmem [thread:$0]  %s1269_s0, 128, %s23_s16, [#allocation3]  }
  0x25   :  { %s1011_s30 = scalar_lea.hbm %s1272_s3, 6144 }
  0x26   :  { %p1012_p2 = scmp.ne.s32.totalorder %s1272_s3, %s1011_s30  ;;  %p1015_p3 = scmp.lt.u32.totalorder %s1011_s30, %s1272_s3 }
  0x28   :  { %p1017_p4 = pnand %p1015_p3, %p1012_p2 }
  0x2a   :  { %1020 = shalt.err (!%p1017_p4)
}
  0x2b   :  { %s1021_s14 = scalar_lea.vmem %s46_s18, 6144  ;;  %p1026_p6 = scmp.lt.s32.totalorder %s46_s18, %s46_s18 }
  0x2c   :  { %p1022_p5 = scmp.ne.s32.totalorder %s46_s18, %s1021_s14  ;;  %p1027_p7 = scmp.lt.s32.totalorder %s1021_s14, %s1021_s14 }
  0x2e   :  { %p1028_p8 = por %p1027_p7, %p1026_p6 }
  0x30   :  { %p1029_p9 = pnand %p1028_p8, %p1022_p5 }
  0x32   :  { %1032 = shalt.err (!%p1029_p9)
}
  0x33   :  { %51 = dma.hbm_to_vmem [thread:$0]  %s1272_s3, 6144, %s46_s18, [#allocation6], %s1086_s11, %s1086_s11, %s1087_s12  }
  0x34   :  { %s1090_s16 = smov [#allocation8]   ;;  %s1033_s21 = scalar_lea.hbm %s1274_s5, 2048 }
  0x35   :  { %s59_s17 = sshll.u32 %s1090_s16, 4  ;;  %p1034_p10 = scmp.ne.s32.totalorder %s1274_s5, %s1033_s21  ;;  %s60_s17 = int_to_ptr.vmem [resolvable:$true] %s59_s17 }
  0x36   :  { %p1037_p11 = scmp.lt.u32.totalorder %s1033_s21, %s1274_s5 }
  0x38   :  { %p1039_p12 = pnand %p1037_p11, %p1034_p10 }
  0x3a   :  { %1042 = shalt.err (!%p1039_p12)
}
  0x3b   :  { %s1043_s1 = scalar_lea.vmem %s60_s17, 2048  ;;  %p1048_p0 = scmp.lt.s32.totalorder %s60_s17, %s60_s17 }
  0x3c   :  { %p1044_p13 = scmp.ne.s32.totalorder %s60_s17, %s1043_s1  ;;  %p1049_p1 = scmp.lt.s32.totalorder %s1043_s1, %s1043_s1 }
  0x3e   :  { %p1050_p2 = por %p1049_p1, %p1048_p0 }
  0x40   :  { %p1051_p3 = pnand %p1050_p2, %p1044_p13 }
  0x42   :  { %1054 = shalt.err (!%p1051_p3)
}
  0x43   :  { %65 = dma.hbm_to_vmem [thread:$0]  %s1274_s5, 2048, %s60_s17, [#allocation9], %s1086_s11, %s1086_s11, %s1087_s12  }
  0x44   :  { %1077 = dma.done.wait [#allocation3], 128  }
  0x45   :  { %1078 = vsyncadd [#allocation3], 4294967168 }
  0x46   :  { %1079 = dma.done.wait [#allocation6], 8192  }
  0x47   :  { %1080 = vsyncadd [#allocation6], 4294959104 }
  0x48   :  { %1081 = dma.done.wait [#allocation9], 2048  }
  0x49   :  { %1082 = vsyncadd [#allocation9], 4294965248  ;;  %v1091_v0 = vmov 0.0|0.0   ;;  %vm1092_vm0 = vmmov 0   ;;  %v1093_v1 = vmov 0.0   ;;  %v81_v2 = vld [vmem:[#allocation5] sm:$0xff] }
  0x4a   :  { %837 = vmatprep.subr.bf16.mxu0 %v1091_v0  ;;  %694 = vmatprep.mubr.msk.f32.mxu0 %vm1092_vm0, %v1093_v1  ;;  %v82_v3 = vld [vmem:[#allocation5 + $0x8] sm:$0xff]  ;;  %v83_v4 = vld [vmem:[#allocation5 + $0x10] sm:$0xff]  ;;  %v84_v6 = vld [vmem:[#allocation5 + $0x18] sm:$0xff]  ;;  %s1094_s9 = smov [#allocation10]  }
  0x4b   :  { %861 = vmatprep.subr.bf16.mxu1 %v1091_v0  ;;  %729 = vmatprep.mubr.msk.f32.mxu1 %vm1092_vm0, %v1093_v1  ;;  %v838_v5 = vpack.c.bf16 %v82_v3, %v81_v2  ;;  %v841_v7 = vpack.c.bf16 %v84_v6, %v83_v4  ;;  %v85_v8 = vld [vmem:[#allocation5 + $0x20] sm:$0xff]  ;;  %v86_v9 = vld [vmem:[#allocation5 + $0x28] sm:$0xff]  ;;  %v176_v12 = vld [vmem:[#allocation7 + $0x10] sm:$0xff]  ;;  %s559_s10 = sshll.u32 %s1094_s9, 4  ;;  %s560_s10 = int_to_ptr.vmem [resolvable:$true] %s559_s10 }
  0x4c   :  { %v174_v10 = vld [vmem:[#allocation7] sm:$0xff]  ;;  %v175_v11 = vld [vmem:[#allocation7 + $0x8] sm:$0xff]  ;;  %v177_v13 = vld [vmem:[#allocation7 + $0x18] sm:$0xff]  ;;  %v844_v14 = vpack.c.bf16 %v86_v9, %v85_v8  ;;  %s1055_s13 = scalar_lea.vmem %s560_s10, 128  ;;  %p1060_p5 = scmp.lt.s32.totalorder %s560_s10, %s560_s10 }
  0x4d   :  { %839 = vmatpush3.bf16.msra.mxu0 %v838_v5  ;;  %v862_v15 = vpack.c.bf16 %v175_v11, %v174_v10  ;;  %v87_v16 = vld [vmem:[#allocation5 + $0x30] sm:$0xff]  ;;  %v88_v17 = vld [vmem:[#allocation5 + $0x38] sm:$0xff]  ;;  %v865_v18 = vpack.c.bf16 %v177_v13, %v176_v12  ;;  %v178_v19 = vld [vmem:[#allocation7 + $0x20] sm:$0xff]  ;;  %p1056_p4 = scmp.ne.s32.totalorder %s560_s10, %s1055_s13  ;;  %p1061_p6 = scmp.lt.s32.totalorder %s1055_s13, %s1055_s13 }
  0x4e   :  { %840 = vmatprep.subr.bf16.mxu0 %v1091_v0  ;;  %v179_v20 = vld [vmem:[#allocation7 + $0x28] sm:$0xff]  ;;  %v847_v21 = vpack.c.bf16 %v88_v17, %v87_v16  ;;  %v89_v22 = vld [vmem:[#allocation5 + $0x40] sm:$0xff]  ;;  %v180_v25 = vld [vmem:[#allocation7 + $0x30] sm:$0xff] }
  0x4f   :  { %863 = vmatpush3.bf16.msra.mxu1 %v862_v15  ;;  %v90_v23 = vld [vmem:[#allocation5 + $0x48] sm:$0xff]  ;;  %v868_v24 = vpack.c.bf16 %v179_v20, %v178_v19  ;;  %v181_v26 = vld [vmem:[#allocation7 + $0x38] sm:$0xff]  ;;  %v91_v28 = vld [vmem:[#allocation5 + $0x50] sm:$0xff]  ;;  %p1062_p7 = por %p1061_p6, %p1060_p5 }
  0x50   :  { %864 = vmatprep.subr.bf16.mxu1 %v1091_v0  ;;  %v850_v27 = vpack.c.bf16 %v90_v23, %v89_v22  ;;  %v92_v29 = vld [vmem:[#allocation5 + $0x58] sm:$0xff]  ;;  %v871_v30 = vpack.c.bf16 %v181_v26, %v180_v25  ;;  %v182_v31 = vld [vmem:[#allocation7 + $0x40] sm:$0xff]  ;;  %v183_v32 = vld [vmem:[#allocation7 + $0x48] sm:$0xff] }
  0x51   :  { %842 = vmatpush3.bf16.msra.mxu0 %v841_v7  ;;  %v853_v33 = vpack.c.bf16 %v92_v29, %v91_v28  ;;  %v93_v34 = vld [vmem:[#allocation5 + $0x60] sm:$0xff]  ;;  %v94_v35 = vld [vmem:[#allocation5 + $0x68] sm:$0xff]  ;;  %v874_v36 = vpack.c.bf16 %v183_v32, %v182_v31  ;;  %v184_v37 = vld [vmem:[#allocation7 + $0x50] sm:$0xff]  ;;  %p1063_p8 = pnand %p1062_p7, %p1056_p4 }
  0x52   :  { %843 = vmatprep.subr.bf16.mxu0 %v1091_v0  ;;  %v185_v38 = vld [vmem:[#allocation7 + $0x58] sm:$0xff]  ;;  %v856_v39 = vpack.c.bf16 %v94_v35, %v93_v34  ;;  %v95_v40 = vld [vmem:[#allocation5 + $0x70] sm:$0xff]  ;;  %v186_v43 = vld [vmem:[#allocation7 + $0x60] sm:$0xff] }
  0x53   :  { %866 = vmatpush3.bf16.msra.mxu1 %v865_v18  ;;  %v96_v41 = vld [vmem:[#allocation5 + $0x78] sm:$0xff]  ;;  %v877_v42 = vpack.c.bf16 %v185_v38, %v184_v37  ;;  %v187_v44 = vld [vmem:[#allocation7 + $0x68] sm:$0xff]  ;;  %v188_v48 = vld [vmem:[#allocation7 + $0x70] sm:$0xff] }
  0x54   :  { %867 = vmatprep.subr.bf16.mxu1 %v1091_v0  ;;  %v859_v45 = vpack.c.bf16 %v96_v41, %v95_v40  ;;  %v880_v46 = vpack.c.bf16 %v187_v44, %v186_v43  ;;  %v80_v47 = vld [vmem:[#allocation2] sm:$0xff]  ;;  %v269_v51 = vld [vmem:[#allocation7 + $0x80] sm:$0xff]  ;;  %v270_v52 = vld [vmem:[#allocation7 + $0x88] sm:$0xff] }
  0x55   :  { %845 = vmatpush3.bf16.msra.mxu0 %v844_v14  ;;  %v189_v49 = vld [vmem:[#allocation7 + $0x78] sm:$0xff]  ;;  %v271_v53 = vld [vmem:[#allocation7 + $0x90] sm:$0xff]  ;;  %v886_v54 = vpack.c.bf16 %v270_v52, %v269_v51  ;;  %v273_v57 = vld [vmem:[#allocation7 + $0xa0] sm:$0xff] }
  0x56   :  { %846 = vmatprep.subr.bf16.mxu0 %v1091_v0  ;;  %v883_v50 = vpack.c.bf16 %v189_v49, %v188_v48  ;;  %v272_v55 = vld [vmem:[#allocation7 + $0x98] sm:$0xff]  ;;  %v274_v58 = vld [vmem:[#allocation7 + $0xa8] sm:$0xff]  ;;  %v275_v60 = vld [vmem:[#allocation7 + $0xb0] sm:$0xff] }
  0x57   :  { %869 = vmatpush3.bf16.msra.mxu1 %v868_v24  ;;  %v889_v56 = vpack.c.bf16 %v272_v55, %v271_v53  ;;  %v892_v59 = vpack.c.bf16 %v274_v58, %v273_v57  ;;  %v276_v61 = vld [vmem:[#allocation7 + $0xb8] sm:$0xff]  ;;  %v277_v63 = vld [vmem:[#allocation7 + $0xc0] sm:$0xff]  ;;  %v278_v2 = vld [vmem:[#allocation7 + $0xc8] sm:$0xff] }
  0x58   :  { %870 = vmatprep.subr.bf16.mxu1 %v1091_v0  ;;  %v895_v62 = vpack.c.bf16 %v276_v61, %v275_v60  ;;  %v898_v3 = vpack.c.bf16 %v278_v2, %v277_v63  ;;  %v279_v4 = vld [vmem:[#allocation7 + $0xd0] sm:$0xff]  ;;  %v280_v5 = vld [vmem:[#allocation7 + $0xd8] sm:$0xff]  ;;  %v281_v7 = vld [vmem:[#allocation7 + $0xe0] sm:$0xff] }
  0x59   :  { %848 = vmatpush3.bf16.msra.mxu0 %v847_v21  ;;  %v901_v6 = vpack.c.bf16 %v280_v5, %v279_v4  ;;  %v282_v8 = vld [vmem:[#allocation7 + $0xe8] sm:$0xff]  ;;  %v570_v10 = vld [vmem:[%s1271_s2] ss:$0 sm:$0xff]  ;;  %v283_v14 = vld [vmem:[#allocation7 + $0xf0] sm:$0xff] }
  0x5a   :  { %849 = vmatprep.subr.bf16.mxu0 %v1091_v0  ;;  %v904_v9 = vpack.c.bf16 %v282_v8, %v281_v7  ;;  %v284_v15 = vld [vmem:[#allocation7 + $0xf8] sm:$0xff]  ;;  %v365_v17 = vld [vmem:[#allocation7 + $0x100] sm:$0xff]  ;;  %v366_v18 = vld [vmem:[#allocation7 + $0x108] sm:$0xff] }
  0x5b   :  { %872 = vmatpush3.bf16.msra.mxu1 %v871_v30  ;;  %v907_v16 = vpack.c.bf16 %v284_v15, %v283_v14  ;;  %v367_v19 = vld [vmem:[#allocation7 + $0x110] sm:$0xff]  ;;  %v910_v20 = vpack.c.bf16 %v366_v18, %v365_v17  ;;  %v368_v21 = vld [vmem:[#allocation7 + $0x118] sm:$0xff]  ;;  %v369_v23 = vld [vmem:[#allocation7 + $0x120] sm:$0xff] }
  0x5c   :  { %873 = vmatprep.subr.bf16.mxu1 %v1091_v0  ;;  %v913_v22 = vpack.c.bf16 %v368_v21, %v367_v19  ;;  %v370_v24 = vld [vmem:[#allocation7 + $0x128] sm:$0xff]  ;;  %v371_v26 = vld [vmem:[#allocation7 + $0x130] sm:$0xff]  ;;  %v373_v29 = vld [vmem:[#allocation7 + $0x140] sm:$0xff] }
  0x5d   :  { %851 = vmatpush3.bf16.msra.mxu0 %v850_v27  ;;  %v916_v25 = vpack.c.bf16 %v370_v24, %v369_v23  ;;  %v372_v27 = vld [vmem:[#allocation7 + $0x138] sm:$0xff]  ;;  %v374_v30 = vld [vmem:[#allocation7 + $0x148] sm:$0xff]  ;;  %v375_v32 = vld [vmem:[#allocation7 + $0x150] sm:$0xff] }
  0x5e   :  { %852 = vmatprep.subr.bf16.mxu0 %v1091_v0  ;;  %v919_v28 = vpack.c.bf16 %v372_v27, %v371_v26  ;;  %v922_v31 = vpack.c.bf16 %v374_v30, %v373_v29  ;;  %v377_v35 = vld [vmem:[#allocation7 + $0x160] sm:$0xff]  ;;  %v571_v38 = vld [vmem:[%s1273_s4] ss:$0 sm:$0xff]  ;;  %v379_v43 = vld [vmem:[#allocation7 + $0x170] sm:$0xff] }
  0x5f   :  { %875 = vmatpush3.bf16.msra.mxu1 %v874_v36  ;;  %v378_v36 = vld [vmem:[#allocation7 + $0x168] sm:$0xff]  ;;  %v380_v44 = vld [vmem:[#allocation7 + $0x178] sm:$0xff]  ;;  %v461_v48 = vld [vmem:[#allocation8 + $0x10] sm:$0xff] }
  0x60   :  { %876 = vmatprep.subr.bf16.mxu1 %v1091_v0  ;;  %v928_v37 = vpack.c.bf16 %v378_v36, %v377_v35  ;;  %v463_v52 = vld [vmem:[#allocation8 + $0x20] sm:$0xff]  ;;  %v464_v53 = vld [vmem:[#allocation8 + $0x28] sm:$0xff]  ;;  %v466_v55 = vld [vmem:[#allocation8 + $0x38] sm:$0xff] }
  0x61   :  { %854 = vmatpush3.bf16.msra.mxu0 %v853_v33  ;;  %v376_v33 = vld [vmem:[#allocation7 + $0x158] sm:$0xff]  ;;  %v467_v57 = vld [vmem:[#allocation8 + $0x40] sm:$0xff]  ;;  %v468_v58 = vld [vmem:[#allocation8 + $0x48] sm:$0xff] }
  0x62   :  { %855 = vmatprep.subr.bf16.mxu0 %v1091_v0  ;;  %v925_v34 = vpack.c.bf16 %v376_v33, %v375_v32  ;;  %v469_v60 = vld [vmem:[#allocation8 + $0x50] sm:$0xff]  ;;  %v470_v61 = vld [vmem:[#allocation8 + $0x58] sm:$0xff]  ;;  %v471_v63 = vld [vmem:[#allocation8 + $0x60] sm:$0xff] }
  0x63   :  { %878 = vmatpush3.bf16.msra.mxu1 %v877_v42  ;;  %v472_v2 = vld [vmem:[#allocation8 + $0x68] sm:$0xff]  ;;  %v573_v4 = vld [vmem:[%s1273_s4 + $0x1] ss:$0 sm:$0xff]  ;;  %v576_v15 = vld [vmem:[%s1275_s6] ss:$0 sm:$0xff] }
  0x64   :  { %879 = vmatprep.subr.bf16.mxu1 %v1091_v0 }
  0x65   :  { %857 = vmatpush3.bf16.msra.mxu0 %v856_v39 }
  0x66   :  { %858 = vmatprep.subr.bf16.mxu0 %v1091_v0 }
  0x67   :  { %881 = vmatpush3.bf16.msra.mxu1 %v880_v46  ;;  %v459_v46 = vld [vmem:[#allocation8] sm:$0xff] }
  0x68   :  { %882 = vmatprep.subr.bf16.mxu1 %v1091_v0 }
  0x69   :  { %860 = vmatpush3.bf16.msra.mxu0 %v859_v45  ;;  %v931_v45 = vpack.c.bf16 %v380_v44, %v379_v43 }
  0x6a   :  { %885 = vmatprep.subr.bf16.mxu0 %v1091_v0 }
  0x6b   :  { %884 = vmatpush3.bf16.msra.mxu1 %v883_v50  ;;  %v462_v50 = vld [vmem:[#allocation8 + $0x18] sm:$0xff] }
  0x6c   :  { %695 = vmatmul.mubr.f32.vlgmr.msra.gmra.mrb[0].mxu0 %v80_v47  ;;  %909 = vmatprep.subr.bf16.mxu1 %v1091_v0  ;;  %v460_v47 = vld [vmem:[#allocation8 + $0x8] sm:$0xff]  ;;  %v937_v51 = vpack.c.bf16 %v462_v50, %v461_v48 }
  0x6d   :  { %764 = vmatprep.mubr.msk.f32.mxu0 %vm1092_vm0, %v1093_v1  ;;  %887 = vmatpush3.bf16.msra.mxu0 %v886_v54  ;;  %v934_v49 = vpack.c.bf16 %v460_v47, %v459_v46  ;;  %v940_v54 = vpack.c.bf16 %v464_v53, %v463_v52 }
  0x6e   :  { %888 = vmatprep.subr.bf16.mxu0 %v1091_v0 }
  0x71   :  { %890 = vmatpush3.bf16.msra.mxu0 %v889_v56 }
  0x72   :  { %891 = vmatprep.subr.bf16.mxu0 %v1091_v0 }
  0x75   :  { %893 = vmatpush3.bf16.msra.mxu0 %v892_v59  ;;  %v946_v59 = vpack.c.bf16 %v468_v58, %v467_v57 }
  0x76   :  { %894 = vmatprep.subr.bf16.mxu0 %v1091_v0 }
  0x79   :  { %896 = vmatpush3.bf16.msra.mxu0 %v895_v62  ;;  %v949_v62 = vpack.c.bf16 %v470_v61, %v469_v60 }
  0x7a   :  { %897 = vmatprep.subr.bf16.mxu0 %v1091_v0 }
  0x7d   :  { %899 = vmatpush3.bf16.msra.mxu0 %v898_v3  ;;  %v952_v3 = vpack.c.bf16 %v472_v2, %v471_v63 }
  0x7e   :  { %900 = vmatprep.subr.bf16.mxu0 %v1091_v0 }
  0x81   :  { %902 = vmatpush3.bf16.msra.mxu0 %v901_v6 }
  0x82   :  { %903 = vmatprep.subr.bf16.mxu0 %v1091_v0 }
  0x85   :  { %905 = vmatpush3.bf16.msra.mxu0 %v904_v9  ;;  %v473_v9 = vld [vmem:[#allocation8 + $0x70] sm:$0xff] }
  0x86   :  { %906 = vmatprep.subr.bf16.mxu0 %v1091_v0 }
  0x89   :  { %908 = vmatpush3.bf16.msra.mxu0 %v907_v16 }
  0x8a   :  { %933 = vmatprep.subr.bf16.mxu0 %v1091_v0 }
 0x13f   :  { %v170_v11 = vpop.f32.mrb[0].mxu0 }
 0x140   :  { %v171_v12 = vadd.f32 %v570_v10, %v170_v11  ;;  %v696_v13 = vpop.f32.mrb[1].mxu0  ;;  %v474_v10 = vld [vmem:[#allocation8 + $0x78] sm:$0xff] }
 0x141   :  { %v955_v11 = vpack.c.bf16 %v474_v10, %v473_v9 }
 0x142   :  { %730 = vmatmul.mubr.f32.vlgmr.msra.gmra.mrb[0].mxu1 %v171_v12  ;;  %v575_v12 = vld [vmem:[%s1273_s4 + $0x2] ss:$0 sm:$0xff] }
 0x143   :  { %799 = vmatprep.mubr.msk.f32.mxu1 %vm1092_vm0, %v1093_v1  ;;  %911 = vmatpush3.bf16.msra.mxu1 %v910_v20 }
 0x144   :  { %912 = vmatprep.subr.bf16.mxu1 %v1091_v0 }
 0x147   :  { %914 = vmatpush3.bf16.msra.mxu1 %v913_v22 }
 0x148   :  { %915 = vmatprep.subr.bf16.mxu1 %v1091_v0 }
 0x14b   :  { %917 = vmatpush3.bf16.msra.mxu1 %v916_v25 }
 0x14c   :  { %918 = vmatprep.subr.bf16.mxu1 %v1091_v0 }
 0x14f   :  { %920 = vmatpush3.bf16.msra.mxu1 %v919_v28 }
 0x150   :  { %921 = vmatprep.subr.bf16.mxu1 %v1091_v0 }
 0x153   :  { %923 = vmatpush3.bf16.msra.mxu1 %v922_v31 }
 0x154   :  { %924 = vmatprep.subr.bf16.mxu1 %v1091_v0 }
 0x157   :  { %926 = vmatpush3.bf16.msra.mxu1 %v925_v34 }
 0x158   :  { %927 = vmatprep.subr.bf16.mxu1 %v1091_v0 }
 0x15b   :  { %929 = vmatpush3.bf16.msra.mxu1 %v928_v37 }
 0x15c   :  { %930 = vmatprep.subr.bf16.mxu1 %v1091_v0 }
 0x15f   :  { %932 = vmatpush3.bf16.msra.mxu1 %v931_v45 }
 0x215   :  { %v263_v39 = vpop.f32.mrb[0].mxu1 }
 0x216   :  { %v264_v40 = vadd.f32 %v571_v38, %v263_v39  ;;  %v731_v41 = vpop.f32.mrb[1].mxu1 }
 0x218   :  { %v267_v42 = vmax.f32 %v264_v40, 0.0 }
 0x21a   :  { %765 = vmatmul.mubr.f32.vlgmr.msra.gmra.mrb[2].mxu0 %v267_v42 }
 0x21b   :  { %834 = vmatprep.mubr.msk.f32.mxu0 %vm1092_vm0, %v1093_v1  ;;  %935 = vmatpush3.bf16.msra.mxu0 %v934_v49  ;;  %v465_v1 = vld [vmem:[#allocation8 + $0x30] sm:$0xff] }
 0x21c   :  { %936 = vmatprep.subr.bf16.mxu0 %v1091_v0  ;;  %v943_v56 = vpack.c.bf16 %v466_v55, %v465_v1 }
 0x21f   :  { %938 = vmatpush3.bf16.msra.mxu0 %v937_v51 }
 0x220   :  { %939 = vmatprep.subr.bf16.mxu0 %v1091_v0 }
 0x223   :  { %941 = vmatpush3.bf16.msra.mxu0 %v940_v54 }
 0x224   :  { %942 = vmatprep.subr.bf16.mxu0 %v1091_v0 }
 0x227   :  { %944 = vmatpush3.bf16.msra.mxu0 %v943_v56 }
 0x228   :  { %945 = vmatprep.subr.bf16.mxu0 %v1091_v0 }
 0x22b   :  { %947 = vmatpush3.bf16.msra.mxu0 %v946_v59 }
 0x22c   :  { %948 = vmatprep.subr.bf16.mxu0 %v1091_v0 }
 0x22f   :  { %950 = vmatpush3.bf16.msra.mxu0 %v949_v62 }
 0x230   :  { %951 = vmatprep.subr.bf16.mxu0 %v1091_v0 }
 0x233   :  { %953 = vmatpush3.bf16.msra.mxu0 %v952_v3 }
 0x234   :  { %954 = vmatprep.subr.bf16.mxu0 %v1091_v0 }
 0x237   :  { %956 = vmatpush3.bf16.msra.mxu0 %v955_v11 }
 0x2ed   :  { %v359_v5 = vpop.f32.mrb[2].mxu0 }
 0x2ee   :  { %v360_v6 = vadd.f32 %v573_v4, %v359_v5  ;;  %v766_v7 = vpop.f32.mrb[3].mxu0 }
 0x2f0   :  { %v363_v8 = vmax.f32 %v360_v6, 0.0 }
 0x2f2   :  { %800 = vmatmul.mubr.f32.vlgmr.msra.gmra.mrb[2].mxu1 %v363_v8 }
 0x3c5   :  { %v455_v13 = vpop.f32.mrb[2].mxu1 }
 0x3c6   :  { %v456_v14 = vadd.f32 %v575_v12, %v455_v13  ;;  %v801_v0 = vpop.f32.mrb[3].mxu1 }
 0x3c8   :  { %835 = vmatmul.mubr.f32.vlgmr.msra.gmra.mrb[4].mxu0 %v456_v14 }
 0x49b   :  { %v548_v16 = vpop.f32.mrb[4].mxu0 }
 0x49c   :  { %v549_v17 = vadd.f32 %v576_v15, %v548_v16  ;;  %v836_v18 = vpop.f32.mrb[5].mxu0 }
 0x49e   :  { %552 = vst [vmem:[#allocation10] sm:$0xff] %v549_v17 }
 0x49f   :  { %1066 = shalt.err (!%p1063_p8)
}
 0x4a0   :  { %s1067_s0 = scalar_lea.hbm %s1276_s7, 128 }
 0x4a1   :  { %p1068_p9 = scmp.ne.s32.totalorder %s1276_s7, %s1067_s0  ;;  %p1071_p10 = scmp.lt.u32.totalorder %s1067_s0, %s1276_s7 }
 0x4a3   :  { %p1073_p11 = pnand %p1071_p10, %p1068_p9 }
 0x4a5   :  { %1076 = shalt.err (!%p1073_p11)
}
 0x4a6   :  { %562 = dma.vmem_to_hbm [thread:$0]  %s560_s10, 128, %s1276_s7, [#allocation4]  }
 0x4a7   :  { %1083 = dma.done.wait [#allocation4], 128  }
 0x4a8   :  { %1084 = vsyncadd [#allocation4], 4294967168 }
 0x4a9   :  { %566 = vsyncpa [#allocation3], 1 }
 0x4aa   :  { %567 = vsyncpa [#allocation6], 1 }
 0x4ab   :  { %568 = vsyncpa [#allocation9], 1 }
 0x4ac   :  { %569 = vsyncpa [#allocation4], 1 }

// kernel: tpu_custom_call.1
= control target key start
LH: loop header
LB: loop body
LE: loop exit
PB: predicated region body
PF: predicated region fallthrough
CT: control target
= control target key end

     0   :  { %12 = vsyncpa [#allocation3], 0  ;;  %s1269_s0 = inlined_call_operand.hbm [shape: f32[8,128], index: 0, kind: input, shape index: {}]   ;;  %s1270_s1 = inlined_call_operand.hbm [shape: f32[128,128], index: 1, kind: input, shape index: {}]   ;;  %s1271_s2 = inlined_call_operand.vmem [shape: f32[1,128], index: 2, kind: input, shape index: {}]   ;;  %s1272_s3 = inlined_call_operand.hbm [shape: f32[3,128,128], index: 3, kind: input, shape index: {}]   ;;  %s1273_s4 = inlined_call_operand.vmem [shape: f32[3,1,128], index: 4, kind: input, shape index: {}]   ;;  %s1274_s5 = inlined_call_operand.hbm [shape: f32[128,128], index: 5, kind: input, shape index: {}]   ;;  %s1275_s6 = inlined_call_operand.vmem [shape: f32[1,128], index: 6, kind: input, shape index: {}]   ;;  %s1276_s7 = inlined_call_operand.hbm [shape: f32[8,128], index: 7, kind: output, shape index: {}]  }
   0x1   :  { %13 = vsyncpa [#allocation6], 0 }
   0x2   :  { %14 = vsyncpa [#allocation9], 0 }
   0x3   :  { %15 = vsyncpa [#allocation4], 0  ;;  %s1085_s24 = smov [#allocation5]   ;;  %s967_s28 = scalar_lea.hbm %s1270_s1, 2048 }
   0x4   :  { %s31_s25 = sshll.u32 %s1085_s24, 4  ;;  %p968_p0 = scmp.ne.s32.totalorder %s1270_s1, %s967_s28  ;;  %s32_s25 = int_to_ptr.vmem [resolvable:$true] %s31_s25 }
   0x5   :  { %p971_p1 = scmp.lt.u32.totalorder %s967_s28, %s1270_s1 }
   0x7   :  { %p973_p2 = pnand %p971_p1, %p968_p0 }
   0x9   :  { %976 = shalt.err (!%p973_p2)
}
   0xa   :  { %s977_s10 = scalar_lea.vmem %s32_s25, 2048  ;;  %p982_p4 = scmp.lt.s32.totalorder %s32_s25, %s32_s25 }
   0xb   :  { %p978_p3 = scmp.ne.s32.totalorder %s32_s25, %s977_s10  ;;  %p983_p5 = scmp.lt.s32.totalorder %s977_s10, %s977_s10 }
   0xd   :  { %p984_p6 = por %p983_p5, %p982_p4 }
   0xf   :  { %p985_p7 = pnand %p984_p6, %p978_p3 }
  0x11   :  { %988 = shalt.err (!%p985_p7)
}
  0x12   :  { %s1086_s11 = smov 128   ;;  %s1087_s12 = smov 8  }
  0x13   :  { %37 = dma.hbm_to_vmem [thread:$0]  %s1270_s1, 2048, %s32_s25, [#allocation6], %s1086_s11, %s1086_s11, %s1087_s12  }
  0x14   :  { %s1088_s15 = smov [#allocation2]   ;;  %s1089_s17 = smov [#allocation7]  }
  0x15   :  { %s22_s16 = sshll.u32 %s1088_s15, 4  ;;  %s45_s18 = sshll.u32 %s1089_s17, 4  ;;  %s23_s16 = int_to_ptr.vmem [resolvable:$true] %s22_s16  ;;  %s46_s18 = int_to_ptr.vmem [resolvable:$true] %s45_s18 }
  0x16   :  { %s989_s21 = scalar_lea.hbm %s1269_s0, 128 }
  0x17   :  { %p990_p8 = scmp.ne.s32.totalorder %s1269_s0, %s989_s21  ;;  %p993_p9 = scmp.lt.u32.totalorder %s989_s21, %s1269_s0 }
  0x19   :  { %p995_p10 = pnand %p993_p9, %p990_p8 }
  0x1b   :  { %998 = shalt.err (!%p995_p10)
}
  0x1c   :  { %s999_s1 = scalar_lea.vmem %s23_s16, 128  ;;  %p1004_p12 = scmp.lt.s32.totalorder %s23_s16, %s23_s16 }
  0x1d   :  { %p1000_p11 = scmp.ne.s32.totalorder %s23_s16, %s999_s1  ;;  %p1005_p13 = scmp.lt.s32.totalorder %s999_s1, %s999_s1 }
  0x1f   :  { %p1006_p0 = por %p1005_p13, %p1004_p12 }
  0x21   :  { %p1007_p1 = pnand %p1006_p0, %p1000_p11 }
  0x23   :  { %1010 = shalt.err (!%p1007_p1)
}
  0x24   :  { %25 = dma.hbm_to_vmem [thread:$0]  %s1269_s0, 128, %s23_s16, [#allocation3]  }
  0x25   :  { %s1011_s30 = scalar_lea.hbm %s1272_s3, 6144 }
  0x26   :  { %p1012_p2 = scmp.ne.s32.totalorder %s1272_s3, %s1011_s30  ;;  %p1015_p3 = scmp.lt.u32.totalorder %s1011_s30, %s1272_s3 }
  0x28   :  { %p1017_p4 = pnand %p1015_p3, %p1012_p2 }
  0x2a   :  { %1020 = shalt.err (!%p1017_p4)
}
  0x2b   :  { %s1021_s14 = scalar_lea.vmem %s46_s18, 6144  ;;  %p1026_p6 = scmp.lt.s32.totalorder %s46_s18, %s46_s18 }
  0x2c   :  { %p1022_p5 = scmp.ne.s32.totalorder %s46_s18, %s1021_s14  ;;  %p1027_p7 = scmp.lt.s32.totalorder %s1021_s14, %s1021_s14 }
  0x2e   :  { %p1028_p8 = por %p1027_p7, %p1026_p6 }
  0x30   :  { %p1029_p9 = pnand %p1028_p8, %p1022_p5 }
  0x32   :  { %1032 = shalt.err (!%p1029_p9)
}
  0x33   :  { %51 = dma.hbm_to_vmem [thread:$0]  %s1272_s3, 6144, %s46_s18, [#allocation6], %s1086_s11, %s1086_s11, %s1087_s12  }
  0x34   :  { %s1090_s16 = smov [#allocation8]   ;;  %s1033_s21 = scalar_lea.hbm %s1274_s5, 2048 }
  0x35   :  { %s59_s17 = sshll.u32 %s1090_s16, 4  ;;  %p1034_p10 = scmp.ne.s32.totalorder %s1274_s5, %s1033_s21  ;;  %s60_s17 = int_to_ptr.vmem [resolvable:$true] %s59_s17 }
  0x36   :  { %p1037_p11 = scmp.lt.u32.totalorder %s1033_s21, %s1274_s5 }
  0x38   :  { %p1039_p12 = pnand %p1037_p11, %p1034_p10 }
  0x3a   :  { %1042 = shalt.err (!%p1039_p12)
}
  0x3b   :  { %s1043_s1 = scalar_lea.vmem %s60_s17, 2048  ;;  %p1048_p0 = scmp.lt.s32.totalorder %s60_s17, %s60_s17 }
  0x3c   :  { %p1044_p13 = scmp.ne.s32.totalorder %s60_s17, %s1043_s1  ;;  %p1049_p1 = scmp.lt.s32.totalorder %s1043_s1, %s1043_s1 }
  0x3e   :  { %p1050_p2 = por %p1049_p1, %p1048_p0 }
  0x40   :  { %p1051_p3 = pnand %p1050_p2, %p1044_p13 }
  0x42   :  { %1054 = shalt.err (!%p1051_p3)
}
  0x43   :  { %65 = dma.hbm_to_vmem [thread:$0]  %s1274_s5, 2048, %s60_s17, [#allocation9], %s1086_s11, %s1086_s11, %s1087_s12  }
  0x44   :  { %1077 = dma.done.wait [#allocation3], 128  }
  0x45   :  { %1078 = vsyncadd [#allocation3], 4294967168 }
  0x46   :  { %1079 = dma.done.wait [#allocation6], 8192  }
  0x47   :  { %1080 = vsyncadd [#allocation6], 4294959104 }
  0x48   :  { %1081 = dma.done.wait [#allocation9], 2048  }
  0x49   :  { %1082 = vsyncadd [#allocation9], 4294965248  ;;  %v1091_v0 = vmov 0.0|0.0   ;;  %vm1092_vm0 = vmmov 0   ;;  %v1093_v1 = vmov 0.0   ;;  %v81_v2 = vld [vmem:[#allocation5] sm:$0xff] }
  0x4a   :  { %837 = vmatprep.subr.bf16.mxu0 %v1091_v0  ;;  %694 = vmatprep.mubr.msk.f32.mxu0 %vm1092_vm0, %v1093_v1  ;;  %v82_v3 = vld [vmem:[#allocation5 + $0x8] sm:$0xff]  ;;  %v83_v4 = vld [vmem:[#allocation5 + $0x10] sm:$0xff]  ;;  %v84_v6 = vld [vmem:[#allocation5 + $0x18] sm:$0xff]  ;;  %s1094_s9 = smov [#allocation10]  }
  0x4b   :  { %861 = vmatprep.subr.bf16.mxu1 %v1091_v0  ;;  %729 = vmatprep.mubr.msk.f32.mxu1 %vm1092_vm0, %v1093_v1  ;;  %v838_v5 = vpack.c.bf16 %v82_v3, %v81_v2  ;;  %v841_v7 = vpack.c.bf16 %v84_v6, %v83_v4  ;;  %v85_v8 = vld [vmem:[#allocation5 + $0x20] sm:$0xff]  ;;  %v86_v9 = vld [vmem:[#allocation5 + $0x28] sm:$0xff]  ;;  %v176_v12 = vld [vmem:[#allocation7 + $0x10] sm:$0xff]  ;;  %s559_s10 = sshll.u32 %s1094_s9, 4  ;;  %s560_s10 = int_to_ptr.vmem [resolvable:$true] %s559_s10 }
  0x4c   :  { %v174_v10 = vld [vmem:[#allocation7] sm:$0xff]  ;;  %v175_v11 = vld [vmem:[#allocation7 + $0x8] sm:$0xff]  ;;  %v177_v13 = vld [vmem:[#allocation7 + $0x18] sm:$0xff]  ;;  %v844_v14 = vpack.c.bf16 %v86_v9, %v85_v8  ;;  %s1055_s13 = scalar_lea.vmem %s560_s10, 128  ;;  %p1060_p5 = scmp.lt.s32.totalorder %s560_s10, %s560_s10 }
  0x4d   :  { %839 = vmatpush3.bf16.msra.mxu0 %v838_v5  ;;  %v862_v15 = vpack.c.bf16 %v175_v11, %v174_v10  ;;  %v87_v16 = vld [vmem:[#allocation5 + $0x30] sm:$0xff]  ;;  %v88_v17 = vld [vmem:[#allocation5 + $0x38] sm:$0xff]  ;;  %v865_v18 = vpack.c.bf16 %v177_v13, %v176_v12  ;;  %v178_v19 = vld [vmem:[#allocation7 + $0x20] sm:$0xff]  ;;  %p1056_p4 = scmp.ne.s32.totalorder %s560_s10, %s1055_s13  ;;  %p1061_p6 = scmp.lt.s32.totalorder %s1055_s13, %s1055_s13 }
  0x4e   :  { %840 = vmatprep.subr.bf16.mxu0 %v1091_v0  ;;  %v179_v20 = vld [vmem:[#allocation7 + $0x28] sm:$0xff]  ;;  %v847_v21 = vpack.c.bf16 %v88_v17, %v87_v16  ;;  %v89_v22 = vld [vmem:[#allocation5 + $0x40] sm:$0xff]  ;;  %v180_v25 = vld [vmem:[#allocation7 + $0x30] sm:$0xff] }
  0x4f   :  { %863 = vmatpush3.bf16.msra.mxu1 %v862_v15  ;;  %v90_v23 = vld [vmem:[#allocation5 + $0x48] sm:$0xff]  ;;  %v868_v24 = vpack.c.bf16 %v179_v20, %v178_v19  ;;  %v181_v26 = vld [vmem:[#allocation7 + $0x38] sm:$0xff]  ;;  %v91_v28 = vld [vmem:[#allocation5 + $0x50] sm:$0xff]  ;;  %p1062_p7 = por %p1061_p6, %p1060_p5 }
  0x50   :  { %864 = vmatprep.subr.bf16.mxu1 %v1091_v0  ;;  %v850_v27 = vpack.c.bf16 %v90_v23, %v89_v22  ;;  %v92_v29 = vld [vmem:[#allocation5 + $0x58] sm:$0xff]  ;;  %v871_v30 = vpack.c.bf16 %v181_v26, %v180_v25  ;;  %v182_v31 = vld [vmem:[#allocation7 + $0x40] sm:$0xff]  ;;  %v183_v32 = vld [vmem:[#allocation7 + $0x48] sm:$0xff] }
  0x51   :  { %842 = vmatpush3.bf16.msra.mxu0 %v841_v7  ;;  %v853_v33 = vpack.c.bf16 %v92_v29, %v91_v28  ;;  %v93_v34 = vld [vmem:[#allocation5 + $0x60] sm:$0xff]  ;;  %v94_v35 = vld [vmem:[#allocation5 + $0x68] sm:$0xff]  ;;  %v874_v36 = vpack.c.bf16 %v183_v32, %v182_v31  ;;  %v184_v37 = vld [vmem:[#allocation7 + $0x50] sm:$0xff]  ;;  %p1063_p8 = pnand %p1062_p7, %p1056_p4 }
  0x52   :  { %843 = vmatprep.subr.bf16.mxu0 %v1091_v0  ;;  %v185_v38 = vld [vmem:[#allocation7 + $0x58] sm:$0xff]  ;;  %v856_v39 = vpack.c.bf16 %v94_v35, %v93_v34  ;;  %v95_v40 = vld [vmem:[#allocation5 + $0x70] sm:$0xff]  ;;  %v186_v43 = vld [vmem:[#allocation7 + $0x60] sm:$0xff] }
  0x53   :  { %866 = vmatpush3.bf16.msra.mxu1 %v865_v18  ;;  %v96_v41 = vld [vmem:[#allocation5 + $0x78] sm:$0xff]  ;;  %v877_v42 = vpack.c.bf16 %v185_v38, %v184_v37  ;;  %v187_v44 = vld [vmem:[#allocation7 + $0x68] sm:$0xff]  ;;  %v188_v48 = vld [vmem:[#allocation7 + $0x70] sm:$0xff] }
  0x54   :  { %867 = vmatprep.subr.bf16.mxu1 %v1091_v0  ;;  %v859_v45 = vpack.c.bf16 %v96_v41, %v95_v40  ;;  %v880_v46 = vpack.c.bf16 %v187_v44, %v186_v43  ;;  %v80_v47 = vld [vmem:[#allocation2] sm:$0xff]  ;;  %v269_v51 = vld [vmem:[#allocation7 + $0x80] sm:$0xff]  ;;  %v270_v52 = vld [vmem:[#allocation7 + $0x88] sm:$0xff] }
  0x55   :  { %845 = vmatpush3.bf16.msra.mxu0 %v844_v14  ;;  %v189_v49 = vld [vmem:[#allocation7 + $0x78] sm:$0xff]  ;;  %v271_v53 = vld [vmem:[#allocation7 + $0x90] sm:$0xff]  ;;  %v886_v54 = vpack.c.bf16 %v270_v52, %v269_v51  ;;  %v273_v57 = vld [vmem:[#allocation7 + $0xa0] sm:$0xff] }
  0x56   :  { %846 = vmatprep.subr.bf16.mxu0 %v1091_v0  ;;  %v883_v50 = vpack.c.bf16 %v189_v49, %v188_v48  ;;  %v272_v55 = vld [vmem:[#allocation7 + $0x98] sm:$0xff]  ;;  %v274_v58 = vld [vmem:[#allocation7 + $0xa8] sm:$0xff]  ;;  %v275_v60 = vld [vmem:[#allocation7 + $0xb0] sm:$0xff] }
  0x57   :  { %869 = vmatpush3.bf16.msra.mxu1 %v868_v24  ;;  %v889_v56 = vpack.c.bf16 %v272_v55, %v271_v53  ;;  %v892_v59 = vpack.c.bf16 %v274_v58, %v273_v57  ;;  %v276_v61 = vld [vmem:[#allocation7 + $0xb8] sm:$0xff]  ;;  %v277_v63 = vld [vmem:[#allocation7 + $0xc0] sm:$0xff]  ;;  %v278_v2 = vld [vmem:[#allocation7 + $0xc8] sm:$0xff] }
  0x58   :  { %870 = vmatprep.subr.bf16.mxu1 %v1091_v0  ;;  %v895_v62 = vpack.c.bf16 %v276_v61, %v275_v60  ;;  %v898_v3 = vpack.c.bf16 %v278_v2, %v277_v63  ;;  %v279_v4 = vld [vmem:[#allocation7 + $0xd0] sm:$0xff]  ;;  %v280_v5 = vld [vmem:[#allocation7 + $0xd8] sm:$0xff]  ;;  %v281_v7 = vld [vmem:[#allocation7 + $0xe0] sm:$0xff] }
  0x59   :  { %848 = vmatpush3.bf16.msra.mxu0 %v847_v21  ;;  %v901_v6 = vpack.c.bf16 %v280_v5, %v279_v4  ;;  %v282_v8 = vld [vmem:[#allocation7 + $0xe8] sm:$0xff]  ;;  %v570_v10 = vld [vmem:[%s1271_s2] ss:$0 sm:$0xff]  ;;  %v283_v14 = vld [vmem:[#allocation7 + $0xf0] sm:$0xff] }
  0x5a   :  { %849 = vmatprep.subr.bf16.mxu0 %v1091_v0  ;;  %v904_v9 = vpack.c.bf16 %v282_v8, %v281_v7  ;;  %v284_v15 = vld [vmem:[#allocation7 + $0xf8] sm:$0xff]  ;;  %v365_v17 = vld [vmem:[#allocation7 + $0x100] sm:$0xff]  ;;  %v366_v18 = vld [vmem:[#allocation7 + $0x108] sm:$0xff] }
  0x5b   :  { %872 = vmatpush3.bf16.msra.mxu1 %v871_v30  ;;  %v907_v16 = vpack.c.bf16 %v284_v15, %v283_v14  ;;  %v367_v19 = vld [vmem:[#allocation7 + $0x110] sm:$0xff]  ;;  %v910_v20 = vpack.c.bf16 %v366_v18, %v365_v17  ;;  %v368_v21 = vld [vmem:[#allocation7 + $0x118] sm:$0xff]  ;;  %v369_v23 = vld [vmem:[#allocation7 + $0x120] sm:$0xff] }
  0x5c   :  { %873 = vmatprep.subr.bf16.mxu1 %v1091_v0  ;;  %v913_v22 = vpack.c.bf16 %v368_v21, %v367_v19  ;;  %v370_v24 = vld [vmem:[#allocation7 + $0x128] sm:$0xff]  ;;  %v371_v26 = vld [vmem:[#allocation7 + $0x130] sm:$0xff]  ;;  %v373_v29 = vld [vmem:[#allocation7 + $0x140] sm:$0xff] }
  0x5d   :  { %851 = vmatpush3.bf16.msra.mxu0 %v850_v27  ;;  %v916_v25 = vpack.c.bf16 %v370_v24, %v369_v23  ;;  %v372_v27 = vld [vmem:[#allocation7 + $0x138] sm:$0xff]  ;;  %v374_v30 = vld [vmem:[#allocation7 + $0x148] sm:$0xff]  ;;  %v375_v32 = vld [vmem:[#allocation7 + $0x150] sm:$0xff] }
  0x5e   :  { %852 = vmatprep.subr.bf16.mxu0 %v1091_v0  ;;  %v919_v28 = vpack.c.bf16 %v372_v27, %v371_v26  ;;  %v922_v31 = vpack.c.bf16 %v374_v30, %v373_v29  ;;  %v377_v35 = vld [vmem:[#allocation7 + $0x160] sm:$0xff]  ;;  %v571_v38 = vld [vmem:[%s1273_s4] ss:$0 sm:$0xff]  ;;  %v379_v43 = vld [vmem:[#allocation7 + $0x170] sm:$0xff] }
  0x5f   :  { %875 = vmatpush3.bf16.msra.mxu1 %v874_v36  ;;  %v378_v36 = vld [vmem:[#allocation7 + $0x168] sm:$0xff]  ;;  %v380_v44 = vld [vmem:[#allocation7 + $0x178] sm:$0xff]  ;;  %v461_v48 = vld [vmem:[#allocation8 + $0x10] sm:$0xff] }
  0x60   :  { %876 = vmatprep.subr.bf16.mxu1 %v1091_v0  ;;  %v928_v37 = vpack.c.bf16 %v378_v36, %v377_v35  ;;  %v463_v52 = vld [vmem:[#allocation8 + $0x20] sm:$0xff]  ;;  %v464_v53 = vld [vmem:[#allocation8 + $0x28] sm:$0xff]  ;;  %v466_v55 = vld [vmem:[#allocation8 + $0x38] sm:$0xff] }
  0x61   :  { %854 = vmatpush3.bf16.msra.mxu0 %v853_v33  ;;  %v376_v33 = vld [vmem:[#allocation7 + $0x158] sm:$0xff]  ;;  %v467_v57 = vld [vmem:[#allocation8 + $0x40] sm:$0xff]  ;;  %v468_v58 = vld [vmem:[#allocation8 + $0x48] sm:$0xff] }
  0x62   :  { %855 = vmatprep.subr.bf16.mxu0 %v1091_v0  ;;  %v925_v34 = vpack.c.bf16 %v376_v33, %v375_v32  ;;  %v469_v60 = vld [vmem:[#allocation8 + $0x50] sm:$0xff]  ;;  %v470_v61 = vld [vmem:[#allocation8 + $0x58] sm:$0xff]  ;;  %v471_v63 = vld [vmem:[#allocation8 + $0x60] sm:$0xff] }
  0x63   :  { %878 = vmatpush3.bf16.msra.mxu1 %v877_v42  ;;  %v472_v2 = vld [vmem:[#allocation8 + $0x68] sm:$0xff]  ;;  %v573_v4 = vld [vmem:[%s1273_s4 + $0x1] ss:$0 sm:$0xff]  ;;  %v576_v15 = vld [vmem:[%s1275_s6] ss:$0 sm:$0xff] }
  0x64   :  { %879 = vmatprep.subr.bf16.mxu1 %v1091_v0 }
  0x65   :  { %857 = vmatpush3.bf16.msra.mxu0 %v856_v39 }
  0x66   :  { %858 = vmatprep.subr.bf16.mxu0 %v1091_v0 }
  0x67   :  { %881 = vmatpush3.bf16.msra.mxu1 %v880_v46  ;;  %v459_v46 = vld [vmem:[#allocation8] sm:$0xff] }
  0x68   :  { %882 = vmatprep.subr.bf16.mxu1 %v1091_v0 }
  0x69   :  { %860 = vmatpush3.bf16.msra.mxu0 %v859_v45  ;;  %v931_v45 = vpack.c.bf16 %v380_v44, %v379_v43 }
  0x6a   :  { %885 = vmatprep.subr.bf16.mxu0 %v1091_v0 }
  0x6b   :  { %884 = vmatpush3.bf16.msra.mxu1 %v883_v50  ;;  %v462_v50 = vld [vmem:[#allocation8 + $0x18] sm:$0xff] }
  0x6c   :  { %695 = vmatmul.mubr.f32.vlgmr.msra.gmra.mrb[0].mxu0 %v80_v47  ;;  %909 = vmatprep.subr.bf16.mxu1 %v1091_v0  ;;  %v460_v47 = vld [vmem:[#allocation8 + $0x8] sm:$0xff]  ;;  %v937_v51 = vpack.c.bf16 %v462_v50, %v461_v48 }
  0x6d   :  { %764 = vmatprep.mubr.msk.f32.mxu0 %vm1092_vm0, %v1093_v1  ;;  %887 = vmatpush3.bf16.msra.mxu0 %v886_v54  ;;  %v934_v49 = vpack.c.bf16 %v460_v47, %v459_v46  ;;  %v940_v54 = vpack.c.bf16 %v464_v53, %v463_v52 }
  0x6e   :  { %888 = vmatprep.subr.bf16.mxu0 %v1091_v0 }
  0x71   :  { %890 = vmatpush3.bf16.msra.mxu0 %v889_v56 }
  0x72   :  { %891 = vmatprep.subr.bf16.mxu0 %v1091_v0 }
  0x75   :  { %893 = vmatpush3.bf16.msra.mxu0 %v892_v59  ;;  %v946_v59 = vpack.c.bf16 %v468_v58, %v467_v57 }
  0x76   :  { %894 = vmatprep.subr.bf16.mxu0 %v1091_v0 }
  0x79   :  { %896 = vmatpush3.bf16.msra.mxu0 %v895_v62  ;;  %v949_v62 = vpack.c.bf16 %v470_v61, %v469_v60 }
  0x7a   :  { %897 = vmatprep.subr.bf16.mxu0 %v1091_v0 }
  0x7d   :  { %899 = vmatpush3.bf16.msra.mxu0 %v898_v3  ;;  %v952_v3 = vpack.c.bf16 %v472_v2, %v471_v63 }
  0x7e   :  { %900 = vmatprep.subr.bf16.mxu0 %v1091_v0 }
  0x81   :  { %902 = vmatpush3.bf16.msra.mxu0 %v901_v6 }
  0x82   :  { %903 = vmatprep.subr.bf16.mxu0 %v1091_v0 }
  0x85   :  { %905 = vmatpush3.bf16.msra.mxu0 %v904_v9  ;;  %v473_v9 = vld [vmem:[#allocation8 + $0x70] sm:$0xff] }
  0x86   :  { %906 = vmatprep.subr.bf16.mxu0 %v1091_v0 }
  0x89   :  { %908 = vmatpush3.bf16.msra.mxu0 %v907_v16 }
  0x8a   :  { %933 = vmatprep.subr.bf16.mxu0 %v1091_v0 }
 0x13f   :  { %v170_v11 = vpop.f32.mrb[0].mxu0 }
 0x140   :  { %v171_v12 = vadd.f32 %v570_v10, %v170_v11  ;;  %v696_v13 = vpop.f32.mrb[1].mxu0  ;;  %v474_v10 = vld [vmem:[#allocation8 + $0x78] sm:$0xff] }
 0x141   :  { %v955_v11 = vpack.c.bf16 %v474_v10, %v473_v9 }
 0x142   :  { %730 = vmatmul.mubr.f32.vlgmr.msra.gmra.mrb[0].mxu1 %v171_v12  ;;  %v575_v12 = vld [vmem:[%s1273_s4 + $0x2] ss:$0 sm:$0xff] }
 0x143   :  { %799 = vmatprep.mubr.msk.f32.mxu1 %vm1092_vm0, %v1093_v1  ;;  %911 = vmatpush3.bf16.msra.mxu1 %v910_v20 }
 0x144   :  { %912 = vmatprep.subr.bf16.mxu1 %v1091_v0 }
 0x147   :  { %914 = vmatpush3.bf16.msra.mxu1 %v913_v22 }
 0x148   :  { %915 = vmatprep.subr.bf16.mxu1 %v1091_v0 }
 0x14b   :  { %917 = vmatpush3.bf16.msra.mxu1 %v916_v25 }
 0x14c   :  { %918 = vmatprep.subr.bf16.mxu1 %v1091_v0 }
 0x14f   :  { %920 = vmatpush3.bf16.msra.mxu1 %v919_v28 }
 0x150   :  { %921 = vmatprep.subr.bf16.mxu1 %v1091_v0 }
 0x153   :  { %923 = vmatpush3.bf16.msra.mxu1 %v922_v31 }
 0x154   :  { %924 = vmatprep.subr.bf16.mxu1 %v1091_v0 }
 0x157   :  { %926 = vmatpush3.bf16.msra.mxu1 %v925_v34 }
 0x158   :  { %927 = vmatprep.subr.bf16.mxu1 %v1091_v0 }
 0x15b   :  { %929 = vmatpush3.bf16.msra.mxu1 %v928_v37 }
 0x15c   :  { %930 = vmatprep.subr.bf16.mxu1 %v1091_v0 }
 0x15f   :  { %932 = vmatpush3.bf16.msra.mxu1 %v931_v45 }
 0x215   :  { %v263_v39 = vpop.f32.mrb[0].mxu1 }
 0x216   :  { %v264_v40 = vadd.f32 %v571_v38, %v263_v39  ;;  %v731_v41 = vpop.f32.mrb[1].mxu1 }
 0x218   :  { %v267_v42 = vmax.f32 %v264_v40, 0.0 }
 0x21a   :  { %765 = vmatmul.mubr.f32.vlgmr.msra.gmra.mrb[2].mxu0 %v267_v42 }
 0x21b   :  { %834 = vmatprep.mubr.msk.f32.mxu0 %vm1092_vm0, %v1093_v1  ;;  %935 = vmatpush3.bf16.msra.mxu0 %v934_v49  ;;  %v465_v1 = vld [vmem:[#allocation8 + $0x30] sm:$0xff] }
 0x21c   :  { %936 = vmatprep.subr.bf16.mxu0 %v1091_v0  ;;  %v943_v56 = vpack.c.bf16 %v466_v55, %v465_v1 }
 0x21f   :  { %938 = vmatpush3.bf16.msra.mxu0 %v937_v51 }
 0x220   :  { %939 = vmatprep.subr.bf16.mxu0 %v1091_v0 }
 0x223   :  { %941 = vmatpush3.bf16.msra.mxu0 %v940_v54 }
 0x224   :  { %942 = vmatprep.subr.bf16.mxu0 %v1091_v0 }
 0x227   :  { %944 = vmatpush3.bf16.msra.mxu0 %v943_v56 }
 0x228   :  { %945 = vmatprep.subr.bf16.mxu0 %v1091_v0 }
 0x22b   :  { %947 = vmatpush3.bf16.msra.mxu0 %v946_v59 }
 0x22c   :  { %948 = vmatprep.subr.bf16.mxu0 %v1091_v0 }
 0x22f   :  { %950 = vmatpush3.bf16.msra.mxu0 %v949_v62 }
 0x230   :  { %951 = vmatprep.subr.bf16.mxu0 %v1091_v0 }
 0x233   :  { %953 = vmatpush3.bf16.msra.mxu0 %v952_v3 }
 0x234   :  { %954 = vmatprep.subr.bf16.mxu0 %v1091_v0 }
 0x237   :  { %956 = vmatpush3.bf16.msra.mxu0 %v955_v11 }
 0x2ed   :  { %v359_v5 = vpop.f32.mrb[2].mxu0 }
 0x2ee   :  { %v360_v6 = vadd.f32 %v573_v4, %v359_v5  ;;  %v766_v7 = vpop.f32.mrb[3].mxu0 }
 0x2f0   :  { %v363_v8 = vmax.f32 %v360_v6, 0.0 }
 0x2f2   :  { %800 = vmatmul.mubr.f32.vlgmr.msra.gmra.mrb[2].mxu1 %v363_v8 }
 0x3c5   :  { %v455_v13 = vpop.f32.mrb[2].mxu1 }
 0x3c6   :  { %v456_v14 = vadd.f32 %v575_v12, %v455_v13  ;;  %v801_v0 = vpop.f32.mrb[3].mxu1 }
 0x3c8   :  { %835 = vmatmul.mubr.f32.vlgmr.msra.gmra.mrb[4].mxu0 %v456_v14 }
 0x49b   :  { %v548_v16 = vpop.f32.mrb[4].mxu0 }
 0x49c   :  { %v549_v17 = vadd.f32 %v576_v15, %v548_v16  ;;  %v836_v18 = vpop.f32.mrb[5].mxu0 }
 0x49e   :  { %552 = vst [vmem:[#allocation10] sm:$0xff] %v549_v17 }
 0x49f   :  { %1066 = shalt.err (!%p1063_p8)
}
 0x4a0   :  { %s1067_s0 = scalar_lea.hbm %s1276_s7, 128 }
 0x4a1   :  { %p1068_p9 = scmp.ne.s32.totalorder %s1276_s7, %s1067_s0  ;;  %p1071_p10 = scmp.lt.u32.totalorder %s1067_s0, %s1276_s7 }
 0x4a3   :  { %p1073_p11 = pnand %p1071_p10, %p1068_p9 }
 0x4a5   :  { %1076 = shalt.err (!%p1073_p11)
}
 0x4a6   :  { %562 = dma.vmem_to_hbm [thread:$0]  %s560_s10, 128, %s1276_s7, [#allocation4]  }
 0x4a7   :  { %1083 = dma.done.wait [#allocation4], 128  }
 0x4a8   :  { %1084 = vsyncadd [#allocation4], 4294967168 }
 0x4a9   :  { %566 = vsyncpa [#allocation3], 1 }
 0x4aa   :  { %567 = vsyncpa [#allocation6], 1 }
 0x4ab   :  { %568 = vsyncpa [#allocation9], 1 }
 0x4ac   :  { %569 = vsyncpa [#allocation4], 1 }

</bundles_post_ra>
